<compile_context>
chip_gen: v7x
topology: tpu7x:2x2x1
jax: 0.10.0
libtpu: 0.0.40
codegen_flags: <defaults>
</compile_context>

<pallas_src>
import jax
import jax.numpy as jnp
from jax.experimental import pallas as pl
from jax.experimental.pallas import tpu as pltpu


def _pool_matmul_kernel(x_ref, m_ref, o_ref):
    # x_ref: (P_blk, H*W)   block of input planes (flattened spatial)
    # m_ref: (H*W, Ho*Wo)   combined average-pooling matrix
    # o_ref: (P_blk, Ho*Wo) pooled planes (lane-dense output slab)
    o_ref[...] = jnp.dot(
        x_ref[...], m_ref[...], preferred_element_type=jnp.float32
    ).astype(o_ref.dtype)


def _choose_plane_block(num_planes, hw, howo, itemsize):
    """Largest multiple-of-8 divisor of num_planes that keeps the
    double-buffered input+output blocks comfortably inside VMEM (v7x-safe)."""
    per_plane = (hw + howo) * itemsize
    target = (12 * 1024 * 1024) // max(1, 2 * per_plane)
    target = max(8, min(1024, (target // 8) * 8))
    if num_planes <= target:
        return num_planes
    blk = target
    while blk >= 8:
        if num_planes % blk == 0:
            return blk
        blk -= 8
    return num_planes  # fallback: one block (only hit for odd small sizes)


def avgpool_padding(x, num_filters, stride):
    """Equivalent of:
         out = F.pad(x, (0, 0, 0, 0, 0, num_filters - C))
         out = nn.AvgPool2d(stride, stride=stride)(out)
       for x in NCHW layout.
    """
    n, c_in, h, w = x.shape
    assert num_filters >= c_in
    ho, wo = h // stride, w // stride  # AvgPool2d default: floor mode, no padding
    out_dtype = x.dtype

    if c_in == 0:
        return jnp.zeros((n, num_filters, ho, wo), out_dtype)

    hw, howo = h * w, ho * wo
    p = n * c_in

    # Combined pooling matrix M[(i*W+j), (io*Wo+jo)] = 1/(s*s) iff io=i//s, jo=j//s.
    # Rows beyond ho*stride / cols beyond wo*stride are all-zero -> floor mode.
    rr = jnp.arange(hw)
    cc = jnp.arange(howo)
    r_h, r_w = rr // w, rr % w
    c_h, c_w = cc // wo, cc % wo
    mask = ((r_h[:, None] // stride) == c_h[None, :]) & (
        (r_w[:, None] // stride) == c_w[None, :]
    )
    m = jnp.where(mask, 1.0 / float(stride * stride), 0.0).astype(x.dtype)

    # Contiguous (planes, H*W) slab: large linear DMAs, no per-plane tile padding.
    xf = x.reshape(p, hw)

    p_blk = _choose_plane_block(p, hw, howo, jnp.dtype(x.dtype).itemsize)
    grid = (p // p_blk,)

    pooled = pl.pallas_call(
        _pool_matmul_kernel,
        out_shape=jax.ShapeDtypeStruct((p, howo), out_dtype),
        grid_spec=pltpu.PrefetchScalarGridSpec(
            num_scalar_prefetch=0,
            grid=grid,
            in_specs=[
                pl.BlockSpec((p_blk, hw), lambda i: (i, 0)),
                pl.BlockSpec((hw, howo), lambda i: (0, 0)),  # same block every step
            ],
            out_specs=pl.BlockSpec((p_blk, howo), lambda i: (i, 0)),
        ),
        compiler_params=pltpu.CompilerParams(
            dimension_semantics=("parallel",),
            vmem_limit_bytes=64 * 1024 * 1024,
        ),
    )(xf, m)

    pooled = pooled.reshape(n, c_in, ho, wo)
    num_zeros = num_filters - c_in
    if num_zeros == 0:
        return pooled
    # Zero-padded channels are produced here: avg-pool of zeros is zero, and this
    # avoids fetching real planes / burning grid steps just to write zeros.
    zeros = jnp.zeros((n, num_zeros, ho, wo), out_dtype)
    return jnp.concatenate([pooled, zeros], axis=1)


def _reference(x, num_filters, stride):
    n, c, h, w = x.shape
    pad = jnp.zeros((n, num_filters - c, h, w), x.dtype)
    xp = jnp.concatenate([x, pad], axis=1)
    ho, wo = h // stride, w // stride
    xp = xp[:, :, : ho * stride, : wo * stride]
    xp = xp.reshape(n, num_filters, ho, stride, wo, stride)
    return xp.mean(axis=(3, 5))


if __name__ == "__main__":
    key = jax.random.PRNGKey(0)
    batch, channels_in, spatial = 2, 4, 16
    num_filters, stride = 8, 2

    x = jax.random.normal(key, (batch, channels_in, spatial, spatial), jnp.float32)

    out = avgpool_padding(x, num_filters, stride)
    out = jax.block_until_ready(out)

    ref = _reference(x, num_filters, stride)
    assert out.shape == (batch, num_filters, spatial // stride, spatial // stride)
    assert jnp.allclose(out, ref, atol=1e-5, rtol=1e-5)

    print("KERNEL_OK")
</pallas_src>

<mosaic_0001>
module attributes {stable_mosaic.version = 11 : i64} {
  func.func @_pool_matmul_kernel(%arg0: i32, %arg1: memref<8x256xf32, #tpu.memory_space<vmem>>, %arg2: memref<256x64xf32, #tpu.memory_space<vmem>>, %arg3: memref<8x64xf32, #tpu.memory_space<vmem>>) attributes {dimension_semantics = [#tpu.dimension_semantics<parallel>], iteration_bounds = array<i64: 1>, scalar_prefetch = 0 : i64, scratch_operands = 0 : i64, tpu.core_type = #tpu.core_type<tc>, window_params = [{transform_indices = @transform_0, window_bounds = array<i64: 8, 256>}, {pipeline_mode = #tpu.pipeline_mode<synchronous>, transform_indices = @transform_1, window_bounds = array<i64: 256, 64>}, {transform_indices = @transform_2, window_bounds = array<i64: 8, 64>}]} {
    %c0 = arith.constant 0 : index
    %c0_0 = arith.constant 0 : index
    %0 = vector.load %arg1[%c0, %c0_0] : memref<8x256xf32, #tpu.memory_space<vmem>>, vector<8x256xf32>
    %c0_1 = arith.constant 0 : index
    %c0_2 = arith.constant 0 : index
    %1 = vector.load %arg2[%c0_1, %c0_2] : memref<256x64xf32, #tpu.memory_space<vmem>>, vector<256x64xf32>
    %cst = arith.constant dense<0.000000e+00> : vector<8x64xf32>
    %2 = tpu.matmul %0, %1, %cst {dimension_numbers = #tpu.dot_dimension_numbers<[1], [0], [0], [1], [0, 0, 1, 1], [], []>} : vector<8x256xf32>, vector<256x64xf32>, vector<8x64xf32> -> vector<8x64xf32>
    %c0_3 = arith.constant 0 : index
    %c0_4 = arith.constant 0 : index
    %3 = vector.load %arg3[%c0_3, %c0_4] : memref<8x64xf32, #tpu.memory_space<vmem>>, vector<8x64xf32>
    tpu.vector_store %arg3[%c0_3, %c0_4], %2 {strides = array<i32>} : memref<8x64xf32, #tpu.memory_space<vmem>>, vector<8x64xf32>,
    return
  }
  func.func @transform_0(%arg0: i32) -> (i32, i32) {
    %c0_i32 = arith.constant 0 : i32
    %c0_i32_0 = arith.constant 0 : i32
    return %arg0, %c0_i32 : i32, i32
  }
  func.func @transform_1(%arg0: i32) -> (i32, i32) {
    %c0_i32 = arith.constant 0 : i32
    %c0_i32_0 = arith.constant 0 : i32
    %c0_i32_1 = arith.constant 0 : i32
    return %c0_i32, %c0_i32_0 : i32, i32
  }
  func.func @transform_2(%arg0: i32) -> (i32, i32) {
    %c0_i32 = arith.constant 0 : i32
    %c0_i32_0 = arith.constant 0 : i32
    return %arg0, %c0_i32 : i32, i32
  }
}

</mosaic_0001>

<bundles_post_ra>
// kernel: tpu_custom_call.1
= control target key start
LH: loop header
LB: loop body
LE: loop exit
PB: predicated region body
PF: predicated region fallthrough
CT: control target
= control target key end

     0   :  { %7 = vsyncpa [#allocation3], 0  ;;  %s367_s0 = inlined_call_operand.hbm [shape: f32[8,256], index: 0, kind: input, shape index: {}]   ;;  %s368_s1 = inlined_call_operand.hbm [shape: f32[256,64], index: 1, kind: input, shape index: {}]   ;;  %s369_s2 = inlined_call_operand.hbm [shape: f32[8,64], index: 2, kind: output, shape index: {}]  }
   0x1   :  { %8 = vsyncpa [#allocation6], 0 }
   0x2   :  { %9 = vsyncpa [#allocation4], 0  ;;  %s304_s9 = smov [#allocation2]   ;;  %s305_s11 = smov [#allocation5]  }
   0x3   :  { %s16_s10 = sshll.u32 %s304_s9, 4  ;;  %s25_s12 = sshll.u32 %s305_s11, 4  ;;  %s17_s10 = int_to_ptr.vmem [resolvable:$true] %s16_s10  ;;  %s324_s12 = int_to_ptr.vmem [resolvable:$true] %s25_s12 }
   0x4   :  { %s232_s15 = scalar_lea.hbm %s367_s0, 256 }
   0x5   :  { %p233_p0 = scmp.ne.s32.totalorder %s367_s0, %s232_s15  ;;  %p236_p1 = scmp.lt.u32.totalorder %s232_s15, %s367_s0 }
   0x7   :  { %p238_p2 = pnand %p236_p1, %p233_p0 }
   0x9   :  { %241 = shalt.err (!%p238_p2)
}
   0xa   :  { %s242_s20 = scalar_lea.vmem %s17_s10, 256  ;;  %p247_p4 = scmp.lt.s32.totalorder %s17_s10, %s17_s10 }
   0xb   :  { %p243_p3 = scmp.ne.s32.totalorder %s17_s10, %s242_s20  ;;  %p248_p5 = scmp.lt.s32.totalorder %s242_s20, %s242_s20 }
   0xd   :  { %p249_p6 = por %p248_p5, %p247_p4 }
   0xf   :  { %p250_p7 = pnand %p249_p6, %p243_p3 }
  0x11   :  { %253 = shalt.err (!%p250_p7)
}
  0x12   :  { %19 = dma.hbm_to_vmem [thread:$0]  %s367_s0, 256, %s17_s10, [#allocation3]  }
  0x13   :  { %s254_s25 = scalar_lea.hbm %s368_s1, 4096 }
  0x14   :  { %p255_p8 = scmp.ne.s32.totalorder %s368_s1, %s254_s25  ;;  %p258_p9 = scmp.lt.u32.totalorder %s254_s25, %s368_s1 }
  0x16   :  { %p260_p10 = pnand %p258_p9, %p255_p8 }
  0x18   :  { %263 = shalt.err (!%p260_p10)
}
  0x19   :  { %s264_s30 = scalar_lea.vmem %s324_s12, 4096  ;;  %p269_p12 = scmp.lt.s32.totalorder %s324_s12, %s324_s12 }
  0x1a   :  { %p265_p11 = scmp.ne.s32.totalorder %s324_s12, %s264_s30  ;;  %p270_p13 = scmp.lt.s32.totalorder %s264_s30, %s264_s30 }
  0x1c   :  { %p271_p0 = por %p270_p13, %p269_p12 }
  0x1e   :  { %p272_p1 = pnand %p271_p0, %p265_p11 }
  0x20   :  { %275 = shalt.err (!%p272_p1)
}
  0x21   :  { %s306_s0 = smov 128   ;;  %s307_s3 = smov 8  }
  0x22   :  { %31 = dma.hbm_to_vmem [thread:$0]  %s368_s1, 4096, %s324_s12, [#allocation6], %s306_s0, %s306_s0, %s307_s3  }
  0x23   :  { %298 = dma.done.wait [#allocation3], 256  }
  0x24   :  { %299 = vsyncadd [#allocation3], 4294967040 }
  0x25   :  { %300 = dma.done.wait [#allocation6], 4096  }
  0x26   :  { %301 = vsyncadd [#allocation6], 4294963200  ;;  %v56_v0 = vld [vmem:[#allocation5 + $0x80] sm:$0xff]  ;;  %v57_v1 = vld [vmem:[#allocation5 + $0x88] sm:$0xff]  ;;  %s308_s1 = smov [#allocation7]   ;;  %vm142_vm0 = vcmask 523264  }
  0x27   :  { %v40_v2 = vld [vmem:[#allocation5] sm:$0xff]  ;;  %v195_v3 = vpack.c.bf16 %v57_v1, %v56_v0  ;;  %v41_v4 = vld [vmem:[#allocation5 + $0x8] sm:$0xff]  ;;  %v58_v5 = vld [vmem:[#allocation5 + $0x90] sm:$0xff]  ;;  %s150_s6 = sshll.u32 %s308_s1, 4  ;;  %s151_s6 = int_to_ptr.vmem [resolvable:$true] %s150_s6 }
  0x28   :  { %v59_v6 = vld [vmem:[#allocation5 + $0x98] sm:$0xff]  ;;  %v197_v7 = vpack.c.bf16 %v41_v4, %v40_v2  ;;  %v42_v9 = vld [vmem:[#allocation5 + $0x10] sm:$0xff]  ;;  %v60_v11 = vld [vmem:[#allocation5 + $0xa0] sm:$0xff]  ;;  %s276_s7 = scalar_lea.vmem %s151_s6, 128  ;;  %p281_p3 = scmp.lt.s32.totalorder %s151_s6, %s151_s6 }
  0x29   :  { %v199_v8 = vpack.c.bf16 %v59_v6, %v58_v5  ;;  %v43_v10 = vld [vmem:[#allocation5 + $0x18] sm:$0xff]  ;;  %196 = vmatprep.subr.bf16.mxu0 %v195_v3  ;;  %v61_v12 = vld [vmem:[#allocation5 + $0xa8] sm:$0xff]  ;;  %v44_v15 = vld [vmem:[#allocation5 + $0x20] sm:$0xff]  ;;  %p277_p2 = scmp.ne.s32.totalorder %s151_s6, %s276_s7  ;;  %p282_p4 = scmp.lt.s32.totalorder %s276_s7, %s276_s7 }
  0x2a   :  { %198 = vmatpush3.bf16.msra.mxu0 %v197_v7  ;;  %v201_v13 = vpack.c.bf16 %v43_v10, %v42_v9  ;;  %v203_v14 = vpack.c.bf16 %v61_v12, %v60_v11  ;;  %v45_v16 = vld [vmem:[#allocation5 + $0x28] sm:$0xff]  ;;  %v62_v17 = vld [vmem:[#allocation5 + $0xb0] sm:$0xff]  ;;  %v63_v18 = vld [vmem:[#allocation5 + $0xb8] sm:$0xff] }
  0x2b   :  { %200 = vmatprep.subr.bf16.mxu0 %v199_v8  ;;  %v205_v19 = vpack.c.bf16 %v45_v16, %v44_v15  ;;  %v207_v20 = vpack.c.bf16 %v63_v18, %v62_v17  ;;  %v46_v21 = vld [vmem:[#allocation5 + $0x30] sm:$0xff]  ;;  %v47_v22 = vld [vmem:[#allocation5 + $0x38] sm:$0xff]  ;;  %v64_v23 = vld [vmem:[#allocation5 + $0xc0] sm:$0xff]  ;;  %p283_p5 = por %p282_p4, %p281_p3 }
  0x2c   :  { %v65_v24 = vld [vmem:[#allocation5 + $0xc8] sm:$0xff]  ;;  %v39_v25 = vld [vmem:[#allocation2 + $0x8] sm:$0xff]  ;;  %v209_v26 = vpack.c.bf16 %v47_v22, %v46_v21  ;;  %v48_v28 = vld [vmem:[#allocation5 + $0x40] sm:$0xff] }
  0x2d   :  { %136 = vmatprep.mubr.f32.mxu0 %v39_v25  ;;  %v211_v27 = vpack.c.bf16 %v65_v24, %v64_v23  ;;  %v49_v29 = vld [vmem:[#allocation5 + $0x48] sm:$0xff]  ;;  %v66_v30 = vld [vmem:[#allocation5 + $0xd0] sm:$0xff]  ;;  %v67_v31 = vld [vmem:[#allocation5 + $0xd8] sm:$0xff]  ;;  %p284_p6 = pnand %p283_p5, %p277_p2 }
  0x2e   :  { %202 = vmatpush3.bf16.msra.mxu0 %v201_v13  ;;  %v213_v32 = vpack.c.bf16 %v49_v29, %v48_v28  ;;  %v215_v33 = vpack.c.bf16 %v67_v31, %v66_v30  ;;  %v50_v34 = vld [vmem:[#allocation5 + $0x50] sm:$0xff]  ;;  %v51_v35 = vld [vmem:[#allocation5 + $0x58] sm:$0xff]  ;;  %v68_v36 = vld [vmem:[#allocation5 + $0xe0] sm:$0xff] }
  0x2f   :  { %204 = vmatprep.subr.bf16.mxu0 %v203_v14  ;;  %v69_v37 = vld [vmem:[#allocation5 + $0xe8] sm:$0xff]  ;;  %v217_v38 = vpack.c.bf16 %v51_v35, %v50_v34  ;;  %v52_v40 = vld [vmem:[#allocation5 + $0x60] sm:$0xff]  ;;  %v70_v42 = vld [vmem:[#allocation5 + $0xf0] sm:$0xff] }
  0x30   :  { %v219_v39 = vpack.c.bf16 %v69_v37, %v68_v36  ;;  %v53_v41 = vld [vmem:[#allocation5 + $0x68] sm:$0xff]  ;;  %v71_v43 = vld [vmem:[#allocation5 + $0xf8] sm:$0xff]  ;;  %v54_v46 = vld [vmem:[#allocation5 + $0x70] sm:$0xff] }
  0x31   :  { %v221_v44 = vpack.c.bf16 %v53_v41, %v52_v40  ;;  %v223_v45 = vpack.c.bf16 %v71_v43, %v70_v42  ;;  %v55_v47 = vld [vmem:[#allocation5 + $0x78] sm:$0xff]  ;;  %v38_v49 = vld [vmem:[#allocation2] sm:$0xff] }
  0x32   :  { %206 = vmatpush3.bf16.msra.mxu0 %v205_v19  ;;  %v225_v48 = vpack.c.bf16 %v55_v47, %v54_v46 }
  0x33   :  { %208 = vmatprep.subr.bf16.mxu0 %v207_v20 }
  0x36   :  { %210 = vmatpush3.bf16.msra.mxu0 %v209_v26 }
  0x37   :  { %212 = vmatprep.subr.bf16.mxu0 %v211_v27 }
  0x3a   :  { %214 = vmatpush3.bf16.msra.mxu0 %v213_v32 }
  0x3b   :  { %216 = vmatprep.subr.bf16.mxu0 %v215_v33 }
  0x3e   :  { %218 = vmatpush3.bf16.msra.mxu0 %v217_v38 }
  0x3f   :  { %220 = vmatprep.subr.bf16.mxu0 %v219_v39 }
  0x42   :  { %222 = vmatpush3.bf16.msra.mxu0 %v221_v44 }
  0x43   :  { %224 = vmatprep.subr.bf16.mxu0 %v223_v45 }
  0x46   :  { %226 = vmatpush3.bf16.msra.mxu0 %v225_v48 }
  0x49   :  { %137 = vmatmul.mubr.f32.vlgmr.msra.gmra.mrb[0].mxu0 %v38_v49 }
 0x11c   :  { %v192_v50 = vpop.f32.mrb[0].mxu0 }
 0x11d   :  { %v193_v51 = vpop.f32.mrb[1].mxu0 }
 0x11e   :  { %v194_v52 = vadd.f32 %v193_v51, %v192_v50 }
 0x120   :  { %143 = vst.msk [vmem:[#allocation7] sm:$0xff] %vm142_vm0, %v194_v52 }
 0x121   :  { %287 = shalt.err (!%p284_p6)
}
 0x122   :  { %s288_s10 = scalar_lea.hbm %s369_s2, 128 }
 0x123   :  { %p289_p7 = scmp.ne.s32.totalorder %s369_s2, %s288_s10  ;;  %p292_p8 = scmp.lt.u32.totalorder %s288_s10, %s369_s2 }
 0x125   :  { %p294_p9 = pnand %p292_p8, %p289_p7 }
 0x127   :  { %297 = shalt.err (!%p294_p9)
}
 0x128   :  { %153 = dma.vmem_to_hbm [thread:$0]  %s151_s6, 128, %s369_s2, [#allocation4]  }
 0x129   :  { %302 = dma.done.wait [#allocation4], 128  }
 0x12a   :  { %303 = vsyncadd [#allocation4], 4294967168 }
 0x12b   :  { %157 = vsyncpa [#allocation3], 1 }
 0x12c   :  { %158 = vsyncpa [#allocation6], 1 }
 0x12d   :  { %159 = vsyncpa [#allocation4], 1 }

</bundles_post_ra>
